<compile_context>
chip_gen: v5e
topology: v5e:2x2
jax: 0.10.0
libtpu: 0.0.40
codegen_flags: <defaults>
</compile_context>

<pallas_src>
import functools

import jax
import jax.numpy as jnp
from jax.experimental import pallas as pl
from jax.experimental.pallas import tpu as pltpu


def _round_up(x, m):
    return (x + m - 1) // m * m


def _pad_to(a, shape):
    return jnp.pad(a, [(0, t - s) for s, t in zip(a.shape, shape)])


def _span_head_kernel(num_labels, hidden_concat,
                      x_ref, ws_ref, bs_ref, w0t_ref, w0b_ref, b0_ref,
                      g_ref, bt_ref, w1_ref, b1_ref, start_ref, end_ref):
    x = x_ref[...]                                   # (TM, H) f32
    tm_rows = x.shape[0]
    c_pad = ws_ref.shape[1]
    hc_pad = w0t_ref.shape[1]

    # ---- PoolerStartLogits: Linear(H -> C); C padded to 128 lanes (dense vst) ----
    start = jnp.dot(x, ws_ref[...], preferred_element_type=jnp.float32) + bs_ref[...]
    start_ref[...] = start.astype(start_ref.dtype)

    # ---- softmax over the real C labels only (padded lanes masked out) ----
    col = jax.lax.broadcasted_iota(jnp.int32, (tm_rows, c_pad), 1)
    s_masked = jnp.where(col < num_labels, start, jnp.float32(-1e30))
    m = jnp.max(s_masked, axis=-1, keepdims=True)
    e = jnp.exp(s_masked - m)                        # padded lanes -> exp(-big) == 0
    denom = jnp.sum(e, axis=-1, keepdims=True)
    # EUP approx reciprocal (co-issues on the otherwise-idle EUP slot) plus one
    # Newton step so full f32 accuracy survives the LayerNorm amplification.
    r = pl.reciprocal(denom, approx=True)
    r = r * (2.0 - denom * r)
    p = e * r                                        # (TM, C_pad); zeros in pad lanes

    # ---- PoolerEndLogits, concat-free:
    #      concat([x, p]) @ w0  ==  x @ w0_top + p @ w0_bot  (no lane-shuffle copy)
    h = (jnp.dot(x, w0t_ref[...], preferred_element_type=jnp.float32)
         + jnp.dot(p, w0b_ref[...], preferred_element_type=jnp.float32)
         + b0_ref[...])

    # LayerNorm over the real H+C features; padded feature lanes are exactly
    # zero (zero-padded weight columns/bias), and are masked out of the stats.
    fmask = (jax.lax.broadcasted_iota(jnp.int32, (tm_rows, hc_pad), 1)
             < hidden_concat).astype(jnp.float32)
    th = jnp.tanh(h) * fmask
    inv_hc = jnp.float32(1.0 / hidden_concat)
    mu = jnp.sum(th, axis=-1, keepdims=True) * inv_hc
    diff = (th - mu) * fmask
    var = jnp.sum(diff * diff, axis=-1, keepdims=True) * inv_hc
    hn = diff * jax.lax.rsqrt(var + 1e-5)            # nn.LayerNorm default eps
    hn = hn * g_ref[...] + bt_ref[...]               # gamma/beta zero in pad lanes

    end = jnp.dot(hn, w1_ref[...], preferred_element_type=jnp.float32) + b1_ref[...]
    end_ref[...] = end.astype(end_ref.dtype)


def bert_span_head(seq_out, params, *, tm=256):
    """Runs the BertSpan head. seq_out: (B, S, H) float32. Returns (start, end) logits."""
    B, S, H = seq_out.shape
    C = params["w_start"].shape[1]
    HC = H + C
    C_pad = _round_up(max(C, 128), 128)
    HC_pad = _round_up(max(HC, 128), 128)

    # Flatten (B, S) -> rows; every op in the head is row-independent.
    total = B * S
    TM = min(tm, _round_up(total, 8))
    rows_pad = _round_up(total, TM)
    x = seq_out.reshape(total, H).astype(jnp.float32)
    if rows_pad != total:
        x = jnp.pad(x, ((0, rows_pad - total), (0, 0)))

    # One-time parameter prep: zero-pad label/feature dims to 128 lanes and
    # split w0 so the lane-axis concat disappears from the kernel.
    w0 = params["w0"]
    ws = _pad_to(params["w_start"], (H, C_pad))
    bs = _pad_to(params["b_start"].reshape(1, C), (1, C_pad))
    w0t = _pad_to(w0[:H, :], (H, HC_pad))
    w0b = _pad_to(w0[H:, :], (C_pad, HC_pad))
    b0 = _pad_to(params["b0"].reshape(1, HC), (1, HC_pad))
    g = _pad_to(params["ln_g"].reshape(1, HC), (1, HC_pad))
    bt = _pad_to(params["ln_b"].reshape(1, HC), (1, HC_pad))
    w1 = _pad_to(params["w1"], (HC_pad, C_pad))
    b1 = _pad_to(params["b1"].reshape(1, C), (1, C_pad))

    def rows_spec(last):
        return pl.BlockSpec((TM, last), lambda i: (i, 0))

    def const_spec(shape):
        # Broadcast weight/bias blocks: index_map constant across the grid.
        return pl.BlockSpec(shape, lambda i: (0, 0))

    grid_spec = pltpu.PrefetchScalarGridSpec(
        num_scalar_prefetch=0,
        grid=(rows_pad // TM,),
        in_specs=[
            rows_spec(H),                    # activations, row-tiled
            const_spec((H, C_pad)),          # start_fc weight (padded)
            const_spec((1, C_pad)),          # start_fc bias
            const_spec((H, HC_pad)),         # end_fc dense_0 weight, top rows
            const_spec((C_pad, HC_pad)),     # end_fc dense_0 weight, bottom rows
            const_spec((1, HC_pad)),         # end_fc dense_0 bias
            const_spec((1, HC_pad)),         # LayerNorm gamma
            const_spec((1, HC_pad)),         # LayerNorm beta
            const_spec((HC_pad, C_pad)),     # end_fc dense_1 weight
            const_spec((1, C_pad)),          # end_fc dense_1 bias
        ],
        out_specs=[rows_spec(C_pad), rows_spec(C_pad)],
    )

    kernel = functools.partial(_span_head_kernel, C, HC)

    start_p, end_p = pl.pallas_call(
        kernel,
        out_shape=(
            jax.ShapeDtypeStruct((rows_pad, C_pad), jnp.float32),
            jax.ShapeDtypeStruct((rows_pad, C_pad), jnp.float32),
        ),
        grid_spec=grid_spec,
        compiler_params=pltpu.CompilerParams(
            dimension_semantics=("parallel",)),
    )(x, ws, bs, w0t, w0b, b0, g, bt, w1, b1)

    start = start_p[:total, :C].reshape(B, S, C)
    end = end_p[:total, :C].reshape(B, S, C)
    return start, end


def reference_head(seq_out, params):
    start = seq_out @ params["w_start"] + params["b_start"]
    p = jax.nn.softmax(start, axis=-1)
    xc = jnp.concatenate([seq_out, p], axis=-1)
    h = jnp.tanh(xc @ params["w0"] + params["b0"])
    mu = jnp.mean(h, axis=-1, keepdims=True)
    var = jnp.mean(jnp.square(h - mu), axis=-1, keepdims=True)
    hn = (h - mu) / jnp.sqrt(var + 1e-5) * params["ln_g"] + params["ln_b"]
    end = hn @ params["w1"] + params["b1"]
    return start, end


if __name__ == "__main__":
    # Small shapes consistent with the module's forward.
    B, S, H, C = 2, 16, 32, 8          # batch, seq_len, hidden_size, num_labels
    HC = H + C
    VOCAB = 50

    key = jax.random.PRNGKey(0)
    keys = jax.random.split(key, 10)

    # Deterministic synthetic parameters (shapes from the module's __init__),
    # stored as (in_features, out_features): y = x @ W + b.
    params = {
        "w_start": jax.random.normal(keys[0], (H, C), jnp.float32) * 0.05,
        "b_start": jax.random.normal(keys[1], (1, C), jnp.float32) * 0.01,
        "w0":      jax.random.normal(keys[2], (HC, HC), jnp.float32) * 0.05,
        "b0":      jax.random.normal(keys[3], (1, HC), jnp.float32) * 0.01,
        "ln_g":    jnp.ones((1, HC), jnp.float32),
        "ln_b":    jnp.zeros((1, HC), jnp.float32),
        "w1":      jax.random.normal(keys[4], (HC, C), jnp.float32) * 0.05,
        "b1":      jax.random.normal(keys[5], (1, C), jnp.float32) * 0.01,
    }

    # Synthetic "BERT" backbone output: embedding lookup + positional signal,
    # masked by attention_mask (stands in for AutoModel; see TODO above).
    input_ids = jax.random.randint(keys[6], (B, S), 0, VOCAB)
    attention_mask = jnp.ones((B, S), jnp.float32)
    emb_table = jax.random.normal(keys[7], (VOCAB, H), jnp.float32) * 0.1
    pos_emb = jax.random.normal(keys[8], (S, H), jnp.float32) * 0.02
    sequence_output = (emb_table[input_ids] + pos_emb[None]) * attention_mask[..., None]
    # dropout(args.dropout_prob) is identity in eval mode.

    start_logits, end_logits = bert_span_head(sequence_output, params)
    jax.block_until_ready((start_logits, end_logits))

    ref_start, ref_end = reference_head(sequence_output, params)
    assert start_logits.shape == (B, S, C) and end_logits.shape == (B, S, C)
    assert jnp.allclose(start_logits, ref_start, atol=1e-4, rtol=1e-4)
    assert jnp.allclose(end_logits, ref_end, atol=1e-4, rtol=1e-4)

    print("KERNEL_OK")
</pallas_src>

<mosaic_0001>
module attributes {stable_mosaic.version = 11 : i64} {
  func.func @_span_head_kernel(%arg0: i32, %arg1: memref<32x32xf32, #tpu.memory_space<vmem>>, %arg2: memref<32x128xf32, #tpu.memory_space<vmem>>, %arg3: memref<1x128xf32, #tpu.memory_space<vmem>>, %arg4: memref<32x128xf32, #tpu.memory_space<vmem>>, %arg5: memref<128x128xf32, #tpu.memory_space<vmem>>, %arg6: memref<1x128xf32, #tpu.memory_space<vmem>>, %arg7: memref<1x128xf32, #tpu.memory_space<vmem>>, %arg8: memref<1x128xf32, #tpu.memory_space<vmem>>, %arg9: memref<128x128xf32, #tpu.memory_space<vmem>>, %arg10: memref<1x128xf32, #tpu.memory_space<vmem>>, %arg11: memref<32x128xf32, #tpu.memory_space<vmem>>, %arg12: memref<32x128xf32, #tpu.memory_space<vmem>>) attributes {dimension_semantics = [#tpu.dimension_semantics<parallel>], iteration_bounds = array<i64: 1>, scalar_prefetch = 0 : i64, scratch_operands = 0 : i64, tpu.core_type = #tpu.core_type<tc>, window_params = [{transform_indices = @transform_0, window_bounds = array<i64: 32, 32>}, {pipeline_mode = #tpu.pipeline_mode<synchronous>, transform_indices = @transform_1, window_bounds = array<i64: 32, 128>}, {pipeline_mode = #tpu.pipeline_mode<synchronous>, transform_indices = @transform_2, window_bounds = array<i64: 1, 128>}, {pipeline_mode = #tpu.pipeline_mode<synchronous>, transform_indices = @transform_3, window_bounds = array<i64: 32, 128>}, {pipeline_mode = #tpu.pipeline_mode<synchronous>, transform_indices = @transform_4, window_bounds = array<i64: 128, 128>}, {pipeline_mode = #tpu.pipeline_mode<synchronous>, transform_indices = @transform_5, window_bounds = array<i64: 1, 128>}, {pipeline_mode = #tpu.pipeline_mode<synchronous>, transform_indices = @transform_6, window_bounds = array<i64: 1, 128>}, {pipeline_mode = #tpu.pipeline_mode<synchronous>, transform_indices = @transform_7, window_bounds = array<i64: 1, 128>}, {pipeline_mode = #tpu.pipeline_mode<synchronous>, transform_indices = @transform_8, window_bounds = array<i64: 128, 128>}, {pipeline_mode = #tpu.pipeline_mode<synchronous>, transform_indices = @transform_9, window_bounds = array<i64: 1, 128>}, {transform_indices = @transform_10, window_bounds = array<i64: 32, 128>}, {transform_indices = @transform_11, window_bounds = array<i64: 32, 128>}]} {
    %c0 = arith.constant 0 : index
    %c0_0 = arith.constant 0 : index
    %0 = vector.load %arg1[%c0, %c0_0] : memref<32x32xf32, #tpu.memory_space<vmem>>, vector<32x32xf32>
    %c0_1 = arith.constant 0 : index
    %c0_2 = arith.constant 0 : index
    %1 = vector.load %arg2[%c0_1, %c0_2] : memref<32x128xf32, #tpu.memory_space<vmem>>, vector<32x128xf32>
    %cst = arith.constant dense<0.000000e+00> : vector<32x128xf32>
    %2 = tpu.matmul %0, %1, %cst {dimension_numbers = #tpu.dot_dimension_numbers<[1], [0], [0], [1], [0, 0, 1, 1], [], []>} : vector<32x32xf32>, vector<32x128xf32>, vector<32x128xf32> -> vector<32x128xf32>
    %c0_3 = arith.constant 0 : index
    %c0_4 = arith.constant 0 : index
    %3 = vector.load %arg3[%c0_3, %c0_4] : memref<1x128xf32, #tpu.memory_space<vmem>>, vector<1x128xf32>
    %4 = vector.broadcast %3 : vector<1x128xf32> to vector<32x128xf32>
    %5 = arith.addf %2, %4 : vector<32x128xf32>
    %c0_5 = arith.constant 0 : index
    %c0_6 = arith.constant 0 : index
    %6 = vector.load %arg11[%c0_5, %c0_6] : memref<32x128xf32, #tpu.memory_space<vmem>>, vector<32x128xf32>
    tpu.vector_store %arg11[%c0_5, %c0_6], %5 {strides = array<i32>} : memref<32x128xf32, #tpu.memory_space<vmem>>, vector<32x128xf32>,
    %7 = tpu.iota {dimensions = array<i32: 1>} : vector<32x128xi32>
    %c8_i32 = arith.constant 8 : i32
    %8 = vector.broadcast %c8_i32 : i32 to vector<32x128xi32>
    %9 = arith.cmpi slt, %7, %8 : vector<32x128xi32>
    %cst_7 = arith.constant -1.000000e+30 : f32
    %10 = vector.broadcast %cst_7 : f32 to vector<32x128xf32>
    %11 = arith.select %9, %5, %10 : vector<32x128xi1>, vector<32x128xf32>
    %cst_8 = arith.constant dense<0xFF800000> : vector<32xf32>
    %12 = vector.multi_reduction <maximumf>, %11, %cst_8 [1] : vector<32x128xf32> to vector<32xf32>
    %13 = vector.shape_cast %12 : vector<32xf32> to vector<32x1xf32>
    %14 = vector.broadcast %13 : vector<32x1xf32> to vector<32x128xf32>
    %15 = arith.subf %11, %14 : vector<32x128xf32>
    %16 = math.exp %15 : vector<32x128xf32>
    %cst_9 = arith.constant dense<0.000000e+00> : vector<32xf32>
    %17 = vector.multi_reduction <add>, %16, %cst_9 [1] : vector<32x128xf32> to vector<32xf32>
    %18 = vector.shape_cast %17 : vector<32xf32> to vector<32x1xf32>
    %19 = tpu.reciprocal %18 {approx = true} : vector<32x1xf32> -> vector<32x1xf32>
    %20 = arith.mulf %18, %19 : vector<32x1xf32>
    %cst_10 = arith.constant 2.000000e+00 : f32
    %21 = vector.broadcast %cst_10 : f32 to vector<32x1xf32>
    %22 = arith.subf %21, %20 : vector<32x1xf32>
    %23 = arith.mulf %19, %22 : vector<32x1xf32>
    %24 = vector.broadcast %23 : vector<32x1xf32> to vector<32x128xf32>
    %25 = arith.mulf %16, %24 : vector<32x128xf32>
    %c0_11 = arith.constant 0 : index
    %c0_12 = arith.constant 0 : index
    %26 = vector.load %arg4[%c0_11, %c0_12] : memref<32x128xf32, #tpu.memory_space<vmem>>, vector<32x128xf32>
    %cst_13 = arith.constant dense<0.000000e+00> : vector<32x128xf32>
    %27 = tpu.matmul %0, %26, %cst_13 {dimension_numbers = #tpu.dot_dimension_numbers<[1], [0], [0], [1], [0, 0, 1, 1], [], []>} : vector<32x32xf32>, vector<32x128xf32>, vector<32x128xf32> -> vector<32x128xf32>
    %c0_14 = arith.constant 0 : index
    %c0_15 = arith.constant 0 : index
    %28 = vector.load %arg5[%c0_14, %c0_15] : memref<128x128xf32, #tpu.memory_space<vmem>>, vector<128x128xf32>
    %cst_16 = arith.constant dense<0.000000e+00> : vector<32x128xf32>
    %29 = tpu.matmul %25, %28, %cst_16 {dimension_numbers = #tpu.dot_dimension_numbers<[1], [0], [0], [1], [0, 0, 1, 1], [], []>} : vector<32x128xf32>, vector<128x128xf32>, vector<32x128xf32> -> vector<32x128xf32>
    %30 = arith.addf %27, %29 : vector<32x128xf32>
    %c0_17 = arith.constant 0 : index
    %c0_18 = arith.constant 0 : index
    %31 = vector.load %arg6[%c0_17, %c0_18] : memref<1x128xf32, #tpu.memory_space<vmem>>, vector<1x128xf32>
    %32 = vector.broadcast %31 : vector<1x128xf32> to vector<32x128xf32>
    %33 = arith.addf %30, %32 : vector<32x128xf32>
    %34 = tpu.iota {dimensions = array<i32: 1>} : vector<32x128xi32>
    %c40_i32 = arith.constant 40 : i32
    %35 = vector.broadcast %c40_i32 : i32 to vector<32x128xi32>
    %36 = arith.cmpi slt, %34, %35 : vector<32x128xi32>
    %37 = arith.extui %36 : vector<32x128xi1> to vector<32x128xi32>
    %38 = arith.sitofp %37 : vector<32x128xi32> to vector<32x128xf32>
    %39 = math.tanh %33 : vector<32x128xf32>
    %40 = arith.mulf %39, %38 : vector<32x128xf32>
    %cst_19 = arith.constant dense<0.000000e+00> : vector<32xf32>
    %41 = vector.multi_reduction <add>, %40, %cst_19 [1] : vector<32x128xf32> to vector<32xf32>
    %42 = vector.shape_cast %41 : vector<32xf32> to vector<32x1xf32>
    %cst_20 = arith.constant 2.500000e-02 : f32
    %43 = vector.broadcast %cst_20 : f32 to vector<32x1xf32>
    %44 = arith.mulf %42, %43 : vector<32x1xf32>
    %45 = vector.broadcast %44 : vector<32x1xf32> to vector<32x128xf32>
    %46 = arith.subf %40, %45 : vector<32x128xf32>
    %47 = arith.mulf %46, %38 : vector<32x128xf32>
    %48 = arith.mulf %47, %47 : vector<32x128xf32>
    %cst_21 = arith.constant dense<0.000000e+00> : vector<32xf32>
    %49 = vector.multi_reduction <add>, %48, %cst_21 [1] : vector<32x128xf32> to vector<32xf32>
    %50 = vector.shape_cast %49 : vector<32xf32> to vector<32x1xf32>
    %cst_22 = arith.constant 2.500000e-02 : f32
    %51 = vector.broadcast %cst_22 : f32 to vector<32x1xf32>
    %52 = arith.mulf %50, %51 : vector<32x1xf32>
    %cst_23 = arith.constant 9.99999974E-6 : f32
    %53 = vector.broadcast %cst_23 : f32 to vector<32x1xf32>
    %54 = arith.addf %52, %53 : vector<32x1xf32>
    %55 = math.rsqrt %54 : vector<32x1xf32>
    %56 = vector.broadcast %55 : vector<32x1xf32> to vector<32x128xf32>
    %57 = arith.mulf %47, %56 : vector<32x128xf32>
    %c0_24 = arith.constant 0 : index
    %c0_25 = arith.constant 0 : index
    %58 = vector.load %arg7[%c0_24, %c0_25] : memref<1x128xf32, #tpu.memory_space<vmem>>, vector<1x128xf32>
    %59 = vector.broadcast %58 : vector<1x128xf32> to vector<32x128xf32>
    %60 = arith.mulf %57, %59 : vector<32x128xf32>
    %c0_26 = arith.constant 0 : index
    %c0_27 = arith.constant 0 : index
    %61 = vector.load %arg8[%c0_26, %c0_27] : memref<1x128xf32, #tpu.memory_space<vmem>>, vector<1x128xf32>
    %62 = vector.broadcast %61 : vector<1x128xf32> to vector<32x128xf32>
    %63 = arith.addf %60, %62 : vector<32x128xf32>
    %c0_28 = arith.constant 0 : index
    %c0_29 = arith.constant 0 : index
    %64 = vector.load %arg9[%c0_28, %c0_29] : memref<128x128xf32, #tpu.memory_space<vmem>>, vector<128x128xf32>
    %cst_30 = arith.constant dense<0.000000e+00> : vector<32x128xf32>
    %65 = tpu.matmul %63, %64, %cst_30 {dimension_numbers = #tpu.dot_dimension_numbers<[1], [0], [0], [1], [0, 0, 1, 1], [], []>} : vector<32x128xf32>, vector<128x128xf32>, vector<32x128xf32> -> vector<32x128xf32>
    %c0_31 = arith.constant 0 : index
    %c0_32 = arith.constant 0 : index
    %66 = vector.load %arg10[%c0_31, %c0_32] : memref<1x128xf32, #tpu.memory_space<vmem>>, vector<1x128xf32>
    %67 = vector.broadcast %66 : vector<1x128xf32> to vector<32x128xf32>
    %68 = arith.addf %65, %67 : vector<32x128xf32>
    %c0_33 = arith.constant 0 : index
    %c0_34 = arith.constant 0 : index
    %69 = vector.load %arg12[%c0_33, %c0_34] : memref<32x128xf32, #tpu.memory_space<vmem>>, vector<32x128xf32>
    tpu.vector_store %arg12[%c0_33, %c0_34], %68 {strides = array<i32>} : memref<32x128xf32, #tpu.memory_space<vmem>>, vector<32x128xf32>,
    return
  }
  func.func @transform_0(%arg0: i32) -> (i32, i32) {
    %c0_i32 = arith.constant 0 : i32
    %c0_i32_0 = arith.constant 0 : i32
    return %arg0, %c0_i32 : i32, i32
  }
  func.func @transform_1(%arg0: i32) -> (i32, i32) {
    %c0_i32 = arith.constant 0 : i32
    %c0_i32_0 = arith.constant 0 : i32
    %c0_i32_1 = arith.constant 0 : i32
    return %c0_i32, %c0_i32_0 : i32, i32
  }
  func.func @transform_2(%arg0: i32) -> (i32, i32) {
    %c0_i32 = arith.constant 0 : i32
    %c0_i32_0 = arith.constant 0 : i32
    %c0_i32_1 = arith.constant 0 : i32
    return %c0_i32, %c0_i32_0 : i32, i32
  }
  func.func @transform_3(%arg0: i32) -> (i32, i32) {
    %c0_i32 = arith.constant 0 : i32
    %c0_i32_0 = arith.constant 0 : i32
    %c0_i32_1 = arith.constant 0 : i32
    return %c0_i32, %c0_i32_0 : i32, i32
  }
  func.func @transform_4(%arg0: i32) -> (i32, i32) {
    %c0_i32 = arith.constant 0 : i32
    %c0_i32_0 = arith.constant 0 : i32
    %c0_i32_1 = arith.constant 0 : i32
    return %c0_i32, %c0_i32_0 : i32, i32
  }
  func.func @transform_5(%arg0: i32) -> (i32, i32) {
    %c0_i32 = arith.constant 0 : i32
    %c0_i32_0 = arith.constant 0 : i32
    %c0_i32_1 = arith.constant 0 : i32
    return %c0_i32, %c0_i32_0 : i32, i32
  }
  func.func @transform_6(%arg0: i32) -> (i32, i32) {
    %c0_i32 = arith.constant 0 : i32
    %c0_i32_0 = arith.constant 0 : i32
    %c0_i32_1 = arith.constant 0 : i32
    return %c0_i32, %c0_i32_0 : i32, i32
  }
  func.func @transform_7(%arg0: i32) -> (i32, i32) {
    %c0_i32 = arith.constant 0 : i32
    %c0_i32_0 = arith.constant 0 : i32
    %c0_i32_1 = arith.constant 0 : i32
    return %c0_i32, %c0_i32_0 : i32, i32
  }
  func.func @transform_8(%arg0: i32) -> (i32, i32) {
    %c0_i32 = arith.constant 0 : i32
    %c0_i32_0 = arith.constant 0 : i32
    %c0_i32_1 = arith.constant 0 : i32
    return %c0_i32, %c0_i32_0 : i32, i32
  }
  func.func @transform_9(%arg0: i32) -> (i32, i32) {
    %c0_i32 = arith.constant 0 : i32
    %c0_i32_0 = arith.constant 0 : i32
    %c0_i32_1 = arith.constant 0 : i32
    return %c0_i32, %c0_i32_0 : i32, i32
  }
  func.func @transform_10(%arg0: i32) -> (i32, i32) {
    %c0_i32 = arith.constant 0 : i32
    %c0_i32_0 = arith.constant 0 : i32
    return %arg0, %c0_i32 : i32, i32
  }
  func.func @transform_11(%arg0: i32) -> (i32, i32) {
    %c0_i32 = arith.constant 0 : i32
    %c0_i32_0 = arith.constant 0 : i32
    return %arg0, %c0_i32 : i32, i32
  }
}

</mosaic_0001>

<bundles_post_ra>
// kernel: tpu_custom_call.1
= control target key start
LH: loop header
LB: loop body
LE: loop exit
PB: predicated region body
PF: predicated region fallthrough
CT: control target
= control target key end

     0   :  { %17 = vsyncpa [#allocation3], 0  ;;  %s984_s0 = inlined_call_operand.hbm [shape: f32[32,32], index: 0, kind: input, shape index: {}]   ;;  %s985_s1 = inlined_call_operand.hbm [shape: f32[32,128], index: 1, kind: input, shape index: {}]   ;;  %s986_s2 = inlined_call_operand.vmem [shape: f32[1,128], index: 2, kind: input, shape index: {}]   ;;  %s987_s3 = inlined_call_operand.hbm [shape: f32[32,128], index: 3, kind: input, shape index: {}]   ;;  %s988_s4 = inlined_call_operand.hbm [shape: f32[128,128], index: 4, kind: input, shape index: {}]   ;;  %s989_s5 = inlined_call_operand.vmem [shape: f32[1,128], index: 5, kind: input, shape index: {}]   ;;  %s990_s6 = inlined_call_operand.vmem [shape: f32[1,128], index: 6, kind: input, shape index: {}]   ;;  %s991_s7 = inlined_call_operand.vmem [shape: f32[1,128], index: 7, kind: input, shape index: {}]   ;;  %s992_s8 = inlined_call_operand.hbm [shape: f32[128,128], index: 8, kind: input, shape index: {}]   ;;  %s993_s9 = inlined_call_operand.vmem [shape: f32[1,128], index: 9, kind: input, shape index: {}]   ;;  %s994_s10 = inlined_call_operand.hbm [shape: f32[32,128], index: 10, kind: output, shape index: {0}]   ;;  %s995_s11 = inlined_call_operand.hbm [shape: f32[32,128], index: 11, kind: output, shape index: {1}]  }
   0x1   :  { %18 = vsyncpa [#allocation6], 0 }
   0x2   :  { %19 = vsyncpa [#allocation9], 0 }
   0x3   :  { %20 = vsyncpa [#allocation4], 0 }
   0x4   :  { %21 = vsyncpa [#allocation13], 0  ;;  %s39_s19 = sshll.u32 %s985_s1, 4  ;;  %s785_s20 = smov [#allocation5]   ;;  %s40_s19 = int_to_ptr.hbm [resolvable:$true] %s39_s19 }
   0x5   :  { %s41_s21 = sshll.u32 %s785_s20, 4  ;;  %s67_s24 = sshll.u32 %s988_s4, 4  ;;  %s42_s21 = int_to_ptr.vmem [resolvable:$true] %s41_s21  ;;  %s68_s24 = int_to_ptr.hbm [resolvable:$true] %s67_s24 }
   0x6   :  { %s786_s25 = smov 128   ;;  %s787_s26 = smov 8  }
   0x7   :  { %47 = dma.hbm_to_vmem [thread:$0]  %s40_s19, 512, %s42_s21, [#allocation6], %s786_s25, %s786_s25, %s787_s26  }
   0x8   :  { %s788_s27 = smov [#allocation8]   ;;  %s26_s1 = sshll.u32 %s984_s0, 4  ;;  %s27_s1 = int_to_ptr.hbm [resolvable:$true] %s26_s1 }
   0x9   :  { %s69_s28 = sshll.u32 %s788_s27, 4  ;;  %s54_s13 = sshll.u32 %s987_s3, 4  ;;  %s70_s28 = int_to_ptr.vmem [resolvable:$true] %s69_s28  ;;  %s55_s13 = int_to_ptr.hbm [resolvable:$true] %s54_s13 }
   0xa   :  { %75 = dma.hbm_to_vmem [thread:$0]  %s68_s24, 2048, %s70_s28, [#allocation9], %s786_s25, %s786_s25, %s787_s26  }
   0xb   :  { %s789_s14 = smov [#allocation2]   ;;  %s790_s16 = smov [#allocation7]  }
   0xc   :  { %s28_s15 = sshll.u32 %s789_s14, 4  ;;  %s56_s0 = sshll.u32 %s790_s16, 4  ;;  %s29_s15 = int_to_ptr.vmem [resolvable:$true] %s28_s15  ;;  %s57_s0 = int_to_ptr.vmem [resolvable:$true] %s56_s0 }
   0xd   :  { %34 = dma.hbm_to_vmem [thread:$0]  %s27_s1, 512, %s29_s15, [#allocation3], %s786_s25, %s786_s25, %s787_s26  }
   0xe   :  { %s86_s19 = sshll.u32 %s992_s8, 4  ;;  %s791_s3 = smov [#allocation10]   ;;  %s87_s19 = int_to_ptr.hbm [resolvable:$true] %s86_s19 }
   0xf   :  { %62 = dma.hbm_to_vmem [thread:$0]  %s55_s13, 512, %s57_s0, [#allocation6], %s786_s25, %s786_s25, %s787_s26  }
  0x10   :  { %s88_s20 = sshll.u32 %s791_s3, 4  ;;  %s89_s20 = int_to_ptr.vmem [resolvable:$true] %s88_s20 }
  0x11   :  { %94 = dma.hbm_to_vmem [thread:$0]  %s87_s19, 2048, %s89_s20, [#allocation9], %s786_s25, %s786_s25, %s787_s26  }
  0x12   :  { %775 = dma.done.wait [#allocation3], 512  }
  0x13   :  { %776 = vsyncadd [#allocation3], 4294966784 }
  0x14   :  { %777 = dma.done.wait [#allocation6], 1024  }
  0x15   :  { %778 = vsyncadd [#allocation6], 4294966272 }
  0x16   :  { %779 = dma.done.wait [#allocation9], 4096  }
  0x17   :  { %780 = vsyncadd [#allocation9], 4294963200  ;;  %v124_v0 = vld [vmem:[#allocation5 + $0x18] sm:$0xff]  ;;  %v123_v1 = vld [vmem:[#allocation5 + $0x10] sm:$0xff]  ;;  %vm129_vm0 = vcmask 261120   ;;  %v175_v8 = vlaneseq  ;;  %s486_s30 = sshll.u32 %s994_s10, 4  ;;  %s487_s30 = int_to_ptr.hbm [resolvable:$true] %s486_s30 }
  0x18   :  { %154 = vmatpush.msra.mxu0 %v124_v0  ;;  %v122_v2 = vld [vmem:[#allocation5 + $0x8] sm:$0xff]  ;;  %v121_v3 = vld [vmem:[#allocation5] sm:$0xff]  ;;  %v893_v6 = vld [vmem:[#allocation2 + $0x10] sm:$0xff]  ;;  %s794_s10 = smov [#allocation12]   ;;  %s499_s15 = sshll.u32 %s995_s11, 4  ;;  %s500_s15 = int_to_ptr.hbm [resolvable:$true] %s499_s15 }
  0x19   :  { %v885_v4 = vld [vmem:[#allocation2] sm:$0xff]  ;;  %v889_v5 = vld [vmem:[#allocation2 + $0x8] sm:$0xff]  ;;  %v897_v7 = vld [vmem:[#allocation2 + $0x18] sm:$0xff]  ;;  %v901_v9 = vand.u32 127, %v175_v8  ;;  %s497_s12 = sshll.u32 %s794_s10, 4  ;;  %s498_s12 = int_to_ptr.vmem [resolvable:$true] %s497_s12 }
  0x1a   :  { %155 = vmatpush.msra.mxu0 %v123_v1  ;;  %v570_v10 = vld [vmem:[%s986_s2] ss:$0 sm:$0xff]  ;;  %v249_v26 = vld [vmem:[#allocation8 + $0x78] sm:$0xff]  ;;  %v248_v27 = vld [vmem:[#allocation8 + $0x70] sm:$0xff] }
  0x1b   :  { %vm177_vm1 = vcmp.lt.s32.totalorder %v901_v9, 8  ;;  %528 = vmatpush.msra.mxu1 %v249_v26  ;;  %v247_v28 = vld [vmem:[#allocation8 + $0x68] sm:$0xff]  ;;  %v246_v30 = vld [vmem:[#allocation8 + $0x60] sm:$0xff]  ;;  %v245_v32 = vld [vmem:[#allocation8 + $0x58] sm:$0xff]  ;;  %vm316_vm2 = vcmp.lt.s32.totalorder %v901_v9, 40 }
  0x1c   :  { %156 = vmatpush.msra.mxu0 %v122_v2  ;;  %v244_v35 = vld [vmem:[#allocation8 + $0x50] sm:$0xff]  ;;  %v243_v36 = vld [vmem:[#allocation8 + $0x48] sm:$0xff]  ;;  %v242_v38 = vld [vmem:[#allocation8 + $0x40] sm:$0xff] }
  0x1d   :  { %529 = vmatpush.msra.mxu1 %v248_v27  ;;  %v241_v47 = vld [vmem:[#allocation8 + $0x38] sm:$0xff]  ;;  %v240_v48 = vld [vmem:[#allocation8 + $0x30] sm:$0xff]  ;;  %v239_v50 = vld [vmem:[#allocation8 + $0x28] sm:$0xff] }
  0x1e   :  { %157 = vmatpush.msra.mxu0 %v121_v3  ;;  %v233_v49 = vld [vmem:[#allocation7 + $0x18] sm:$0xff]  ;;  %v232_v51 = vld [vmem:[#allocation7 + $0x10] sm:$0xff]  ;;  %v238_v52 = vld [vmem:[#allocation8 + $0x20] sm:$0xff] }
  0x1f   :  { %519 = vmatmul.msk.f32.vlgmr.msra.gmra.mxu0 %vm129_vm0, %v885_v4  ;;  %530 = vmatpush.msra.mxu1 %v247_v28  ;;  %v231_v53 = vld [vmem:[#allocation7 + $0x8] sm:$0xff]  ;;  %v237_v54 = vld [vmem:[#allocation8 + $0x18] sm:$0xff]  ;;  %v230_v55 = vld [vmem:[#allocation7] sm:$0xff] }
  0x20   :  { %250 = vmatpush.msrb.mxu0 %v249_v26  ;;  %291 = vmatpush.msra.mxu2 %v233_v49  ;;  %v236_v56 = vld [vmem:[#allocation8 + $0x10] sm:$0xff]  ;;  %v235_v57 = vld [vmem:[#allocation8 + $0x8] sm:$0xff]  ;;  %v234_v58 = vld [vmem:[#allocation8] sm:$0xff] }
  0x21   :  { %531 = vmatpush.msra.mxu1 %v246_v30  ;;  %v441_v49 = vld [vmem:[#allocation10 + $0x70] sm:$0xff] }
  0x22   :  { %251 = vmatpush.msrb.mxu0 %v248_v27  ;;  %292 = vmatpush.msra.mxu2 %v232_v51  ;;  %v792_v27 = vmov 0.0  }
  0x23   :  { %532 = vmatpush.msra.mxu1 %v245_v32 }
  0x24   :  { %252 = vmatpush.msrb.mxu0 %v247_v28  ;;  %293 = vmatpush.msra.mxu2 %v231_v53  ;;  %v527_v28 = vsel %vm316_vm2, 1.0, %v792_v27 }
  0x25   :  { %533 = vmatpush.msra.mxu1 %v244_v35 }
  0x26   :  { %253 = vmatpush.msrb.mxu0 %v246_v30  ;;  %294 = vmatpush.msra.mxu2 %v230_v55 }
  0x27   :  { %520 = vmatmul.msk.f32.gmra.mxu0 %vm129_vm0, %v889_v5  ;;  %534 = vmatpush.msra.mxu1 %v243_v36 }
  0x28   :  { %254 = vmatpush.msrb.mxu0 %v245_v32  ;;  %523 = vmatmul.msk.f32.vlgmr.msra.gmra.mxu2 %vm129_vm0, %v885_v4 }
  0x29   :  { %535 = vmatpush.msra.mxu1 %v242_v38 }
  0x2a   :  { %255 = vmatpush.msrb.mxu0 %v244_v35 }
  0x2b   :  { %536 = vmatpush.msra.mxu1 %v241_v47 }
  0x2c   :  { %256 = vmatpush.msrb.mxu0 %v243_v36 }
  0x2d   :  { %537 = vmatpush.msra.mxu1 %v240_v48 }
  0x2e   :  { %257 = vmatpush.msrb.mxu0 %v242_v38 }
  0x2f   :  { %521 = vmatmul.msk.f32.gmra.mxu0 %vm129_vm0, %v893_v6  ;;  %538 = vmatpush.msra.mxu1 %v239_v50 }
  0x30   :  { %258 = vmatpush.msrb.mxu0 %v241_v47  ;;  %524 = vmatmul.msk.f32.gmra.mxu2 %vm129_vm0, %v889_v5 }
  0x31   :  { %539 = vmatpush.msra.mxu1 %v238_v52 }
  0x32   :  { %259 = vmatpush.msrb.mxu0 %v240_v48  ;;  %v442_v48 = vld [vmem:[#allocation10 + $0x78] sm:$0xff] }
  0x33   :  { %540 = vmatpush.msra.mxu1 %v237_v54  ;;  %447 = vmatpush.msrb.mxu2 %v442_v48 }
  0x34   :  { %260 = vmatpush.msrb.mxu0 %v239_v50  ;;  %544 = vmatpush.msra.mxu3 %v442_v48 }
  0x35   :  { %541 = vmatpush.msra.mxu1 %v236_v56  ;;  %448 = vmatpush.msrb.mxu2 %v441_v49 }
  0x36   :  { %261 = vmatpush.msrb.mxu0 %v238_v52  ;;  %545 = vmatpush.msra.mxu3 %v441_v49 }
  0x37   :  { %522 = vmatmul.msk.f32.gmra.mxu0 %vm129_vm0, %v897_v7  ;;  %542 = vmatpush.msra.mxu1 %v235_v57 }
  0x38   :  { %262 = vmatpush.msrb.mxu0 %v237_v54  ;;  %525 = vmatmul.msk.f32.gmra.mxu2 %vm129_vm0, %v893_v6 }
  0x39   :  { %543 = vmatpush.msra.mxu1 %v234_v58 }
  0x3a   :  { %263 = vmatpush.msrb.mxu0 %v236_v56 }
  0x3c   :  { %264 = vmatpush.msrb.mxu0 %v235_v57 }
  0x3e   :  { %265 = vmatpush.msrb.mxu0 %v234_v58 }
  0x40   :  { %526 = vmatmul.msk.f32.gmra.mxu2 %vm129_vm0, %v897_v7 }
  0x9c   :  { %v159_v11 = vpop.f32.mrf.mxu0 }
  0x9d   :  { %v160_v12 = vadd.f32 %v570_v10, %v159_v11 }
  0x9f   :  { %171 = vst [vmem:[#allocation11] sm:$0xff] %v160_v12  ;;  %v178_v13 = vsel %vm177_vm1, %v160_v12, -1e+30 }
  0xa0   :  { %182 = vmax.xlane.f32.xlu1 %v178_v13 }
  0xa4   :  { %v162_v14 = vpop.f32.mrf.mxu0 }
  0xa5   :  { %v163_v15 = vadd.f32 %v570_v10, %v162_v14 }
  0xa7   :  { %172 = vst [vmem:[#allocation11 + $0x8] sm:$0xff] %v163_v15  ;;  %v179_v16 = vsel %vm177_vm1, %v163_v15, -1e+30 }
  0xa8   :  { %184 = vmax.xlane.f32.xlu0 %v179_v16 }
  0xac   :  { %v165_v17 = vpop.f32.mrf.mxu0 }
  0xad   :  { %v166_v18 = vadd.f32 %v570_v10, %v165_v17 }
  0xaf   :  { %173 = vst [vmem:[#allocation11 + $0x10] sm:$0xff] %v166_v18  ;;  %v180_v19 = vsel %vm177_vm1, %v166_v18, -1e+30 }
  0xb0   :  { %186 = vmax.xlane.f32.xlu0 %v180_v19 }
  0xb4   :  { %v168_v20 = vpop.f32.mrf.mxu0 }
  0xb5   :  { %v169_v21 = vadd.f32 %v570_v10, %v168_v20  ;;  %v296_v20 = vpop.f32.mrf.mxu2 }
  0xb7   :  { %174 = vst [vmem:[#allocation11 + $0x18] sm:$0xff] %v169_v21  ;;  %v181_v22 = vsel %vm177_vm1, %v169_v21, -1e+30  ;;  %v571_v21 = vld [vmem:[%s989_s5] ss:$0 sm:$0xff] }
  0xb8   :  { %188 = vmax.xlane.f32.xlu1 %v181_v22 }
 0x113   :  { %v183_v23 = vpop.xlane.xlu1 %182 }
 0x114   :  { %v190_v24 = vsub.f32 %v178_v13, %v183_v23 }
 0x116   :  { %v194_v25 = vmul.f32 1.442695, %v190_v24  ;;  %v299_v24 = vpop.f32.mrf.mxu2 }
 0x118   :  { %575 = vpow2.f32 %v194_v25 }
 0x11b   :  { %v185_v29 = vpop.xlane.xlu0 %184 }
 0x11c   :  { %v191_v31 = vsub.f32 %v179_v16, %v185_v29 }
 0x11e   :  { %v915_v33 = vpop.eup %575  ;;  %v196_v34 = vmul.f32 1.442695, %v191_v31 }
 0x11f   :  { %202 = vadd.xlane.f32.xlu0 %v915_v33 }
 0x120   :  { %577 = vpow2.f32 %v196_v34 }
 0x123   :  { %v187_v37 = vpop.xlane.xlu0 %186 }
 0x124   :  { %v192_v39 = vsub.f32 %v180_v19, %v187_v37 }
 0x126   :  { %v918_v40 = vpop.eup %577  ;;  %v198_v41 = vmul.f32 1.442695, %v192_v39 }
 0x127   :  { %204 = vadd.xlane.f32.xlu2 %v918_v40 }
 0x128   :  { %579 = vpow2.f32 %v198_v41 }
 0x12b   :  { %v189_v42 = vpop.xlane.xlu1 %188 }
 0x12c   :  { %v193_v43 = vsub.f32 %v181_v22, %v189_v42 }
 0x12e   :  { %v921_v44 = vpop.eup %579  ;;  %v200_v45 = vmul.f32 1.442695, %v193_v43 }
 0x12f   :  { %206 = vadd.xlane.f32.xlu2 %v921_v44 }
 0x130   :  { %581 = vpow2.f32 %v200_v45 }
 0x136   :  { %v924_v46 = vpop.eup %581 }
 0x137   :  { %208 = vadd.xlane.f32.xlu1 %v924_v46 }
 0x192   :  { %v203_v59 = vpop.xlane.xlu0 %202 }
 0x193   :  { %583 = vrcp.f32 %v203_v59 }
 0x199   :  { %v584_v60 = vpop.eup %583 }
 0x19a   :  { %v214_v61 = vmul.f32 %v584_v60, %v203_v59  ;;  %v205_v62 = vpop.xlane.xlu2 %204 }
 0x19b   :  { %585 = vrcp.f32 %v205_v62 }
 0x19c   :  { %v218_v63 = vsub.f32 2.0, %v214_v61 }
 0x19e   :  { %v222_v0 = vmul.f32 %v584_v60, %v218_v63 }
 0x1a0   :  { %v226_v1 = vmul.f32 %v915_v33, %v222_v0  ;;  %v302_v33 = vpop.f32.mrf.mxu2 }
 0x1a1   :  { %v586_v2 = vpop.eup %585 }
 0x1a2   :  { %v215_v3 = vmul.f32 %v586_v2, %v205_v62  ;;  %v207_v4 = vpop.xlane.xlu2 %206  ;;  %266 = vmatmul.f32.vlgmr.msrb.gmra.mxu0 %v226_v1 }
 0x1a3   :  { %587 = vrcp.f32 %v207_v4 }
 0x1a4   :  { %v219_v5 = vsub.f32 2.0, %v215_v3 }
 0x1a6   :  { %v223_v6 = vmul.f32 %v586_v2, %v219_v5  ;;  %v439_v5 = vld [vmem:[#allocation10 + $0x60] sm:$0xff] }
 0x1a8   :  { %v227_v8 = vmul.f32 %v918_v40, %v223_v6  ;;  %v305_v39 = vpop.f32.mrf.mxu2  ;;  %v438_v6 = vld [vmem:[#allocation10 + $0x58] sm:$0xff] }
 0x1a9   :  { %v588_v10 = vpop.eup %587 }
 0x1aa   :  { %v216_v11 = vmul.f32 %v588_v10, %v207_v4  ;;  %269 = vmatmul.f32.vlgmr.msra.gmra.mxu1 %v227_v8  ;;  %v209_v7 = vpop.xlane.xlu1 %208  ;;  %v440_v4 = vld [vmem:[#allocation10 + $0x68] sm:$0xff]  ;;  %v437_v8 = vld [vmem:[#allocation10 + $0x50] sm:$0xff] }
 0x1ab   :  { %589 = vrcp.f32 %v209_v7  ;;  %449 = vmatpush.msrb.mxu2 %v440_v4  ;;  %546 = vmatpush.msra.mxu3 %v440_v4 }
 0x1ac   :  { %v220_v12 = vsub.f32 2.0, %v216_v11  ;;  %v435_v11 = vld [vmem:[#allocation10 + $0x40] sm:$0xff] }
 0x1ad   :  { %450 = vmatpush.msrb.mxu2 %v439_v5  ;;  %547 = vmatpush.msra.mxu3 %v439_v5 }
 0x1ae   :  { %v224_v13 = vmul.f32 %v588_v10, %v220_v12  ;;  %v436_v10 = vld [vmem:[#allocation10 + $0x48] sm:$0xff]  ;;  %v433_v12 = vld [vmem:[#allocation10 + $0x30] sm:$0xff] }
 0x1af   :  { %451 = vmatpush.msrb.mxu2 %v438_v6  ;;  %548 = vmatpush.msra.mxu3 %v438_v6 }
 0x1b0   :  { %v228_v14 = vmul.f32 %v921_v44, %v224_v13  ;;  %v432_v13 = vld [vmem:[#allocation10 + $0x28] sm:$0xff] }
 0x1b1   :  { %v590_v15 = vpop.eup %589  ;;  %452 = vmatpush.msrb.mxu2 %v437_v8  ;;  %549 = vmatpush.msra.mxu3 %v437_v8 }
 0x1b2   :  { %v217_v16 = vmul.f32 %v590_v15, %v209_v7  ;;  %272 = vmatmul.f32.gmra.mxu1 %v228_v14  ;;  %v434_v7 = vld [vmem:[#allocation10 + $0x38] sm:$0xff]  ;;  %v431_v14 = vld [vmem:[#allocation10 + $0x20] sm:$0xff] }
 0x1b3   :  { %453 = vmatpush.msrb.mxu2 %v436_v10  ;;  %550 = vmatpush.msra.mxu3 %v436_v10 }
 0x1b4   :  { %v221_v17 = vsub.f32 2.0, %v217_v16  ;;  %v429_v16 = vld [vmem:[#allocation10 + $0x10] sm:$0xff] }
 0x1b5   :  { %454 = vmatpush.msrb.mxu2 %v435_v11  ;;  %551 = vmatpush.msra.mxu3 %v435_v11 }
 0x1b6   :  { %v225_v18 = vmul.f32 %v590_v15, %v221_v17  ;;  %v430_v15 = vld [vmem:[#allocation10 + $0x18] sm:$0xff]  ;;  %v428_v17 = vld [vmem:[#allocation10 + $0x8] sm:$0xff] }
 0x1b7   :  { %455 = vmatpush.msrb.mxu2 %v434_v7  ;;  %552 = vmatpush.msra.mxu3 %v434_v7 }
 0x1b8   :  { %v229_v19 = vmul.f32 %v924_v46, %v225_v18  ;;  %v427_v18 = vld [vmem:[#allocation10] sm:$0xff] }
 0x1b9   :  { %456 = vmatpush.msrb.mxu2 %v433_v12  ;;  %553 = vmatpush.msra.mxu3 %v433_v12 }
 0x1ba   :  { %275 = vmatmul.f32.gmra.mxu1 %v229_v19 }
 0x1bb   :  { %457 = vmatpush.msrb.mxu2 %v432_v13  ;;  %554 = vmatpush.msra.mxu3 %v432_v13 }
 0x1bd   :  { %458 = vmatpush.msrb.mxu2 %v431_v14  ;;  %555 = vmatpush.msra.mxu3 %v431_v14 }
 0x1bf   :  { %459 = vmatpush.msrb.mxu2 %v430_v15  ;;  %556 = vmatpush.msra.mxu3 %v430_v15 }
 0x1c1   :  { %460 = vmatpush.msrb.mxu2 %v429_v16  ;;  %557 = vmatpush.msra.mxu3 %v429_v16 }
 0x1c3   :  { %461 = vmatpush.msrb.mxu2 %v428_v17  ;;  %558 = vmatpush.msra.mxu3 %v428_v17 }
 0x1c5   :  { %462 = vmatpush.msrb.mxu2 %v427_v18  ;;  %559 = vmatpush.msra.mxu3 %v427_v18 }
 0x21f   :  { %v267_v22 = vpop.f32.mrf.mxu0 }
 0x220   :  { %v297_v23 = vadd.f32 %v296_v20, %v267_v22 }
 0x222   :  { %v312_v25 = vadd.f32 %v571_v21, %v297_v23 }
 0x224   :  { %591 = vtanh.f32 %v312_v25 }
 0x227   :  { %v270_v26 = vpop.f32.mrf.mxu1 }
 0x228   :  { %v300_v29 = vadd.f32 %v299_v24, %v270_v26 }
 0x22a   :  { %v592_v30 = vpop.eup %591  ;;  %v313_v31 = vadd.f32 %v571_v21, %v300_v29 }
 0x22b   :  { %v323_v32 = vmul.f32 %v592_v30, %v527_v28 }
 0x22c   :  { %593 = vtanh.f32 %v313_v31 }
 0x22d   :  { %327 = vadd.xlane.f32.xlu1 %v323_v32 }
 0x22f   :  { %v273_v34 = vpop.f32.mrf.mxu1 }
 0x230   :  { %v303_v35 = vadd.f32 %v302_v33, %v273_v34 }
 0x232   :  { %v594_v36 = vpop.eup %593  ;;  %v314_v37 = vadd.f32 %v571_v21, %v303_v35 }
 0x233   :  { %v324_v38 = vmul.f32 %v594_v36, %v527_v28  ;;  %v572_v36 = vld [vmem:[%s990_s6] ss:$0 sm:$0xff]  ;;  %s793_s6 = smov [#allocation11]  }
 0x234   :  { %595 = vtanh.f32 %v314_v37 }
 0x235   :  { %329 = vadd.xlane.f32.xlu2 %v324_v38 }
 0x237   :  { %v276_v40 = vpop.f32.mrf.mxu1 }
 0x238   :  { %v306_v9 = vadd.f32 %v305_v39, %v276_v40  ;;  %v573_v40 = vld [vmem:[%s991_s7] ss:$0 sm:$0xff]  ;;  %s484_s7 = sshll.u32 %s793_s6, 4  ;;  %s485_s7 = int_to_ptr.vmem [resolvable:$true] %s484_s7 }
 0x239   :  { %492 = dma.vmem_to_hbm [thread:$0]  %s485_s7, 512, %s487_s30, [#allocation4], %s786_s25, %s786_s25, %s787_s26  }
 0x23a   :  { %v596_v41 = vpop.eup %595  ;;  %v315_v42 = vadd.f32 %v571_v21, %v306_v9 }
 0x23b   :  { %v325_v43 = vmul.f32 %v596_v41, %v527_v28 }
 0x23c   :  { %597 = vtanh.f32 %v315_v42 }
 0x23d   :  { %331 = vadd.xlane.f32.xlu0 %v325_v43 }
 0x242   :  { %v598_v44 = vpop.eup %597 }
 0x243   :  { %v326_v45 = vmul.f32 %v598_v44, %v527_v28 }
 0x245   :  { %333 = vadd.xlane.f32.xlu2 %v326_v45 }
 0x2a0   :  { %v328_v46 = vpop.xlane.xlu1 %327 }
 0x2a1   :  { %v335_v47 = vmul.f32 0.025, %v328_v46 }
 0x2a3   :  { %v339_v50 = vsub.f32 %v323_v32, %v335_v47 }
 0x2a5   :  { %v943_v51 = vmul.f32 %v527_v28, %v339_v50 }
 0x2a7   :  { %v347_v52 = vmul.f32 %v943_v51, %v943_v51 }
 0x2a8   :  { %v330_v53 = vpop.xlane.xlu2 %329 }
 0x2a9   :  { %v336_v54 = vmul.f32 0.025, %v330_v53  ;;  %351 = vadd.xlane.f32.xlu2 %v347_v52 }
 0x2ab   :  { %v340_v55 = vsub.f32 %v324_v38, %v336_v54 }
 0x2ad   :  { %v947_v56 = vmul.f32 %v527_v28, %v340_v55 }
 0x2af   :  { %v348_v57 = vmul.f32 %v947_v56, %v947_v56 }
 0x2b0   :  { %v332_v58 = vpop.xlane.xlu0 %331 }
 0x2b1   :  { %v337_v59 = vmul.f32 0.025, %v332_v58  ;;  %353 = vadd.xlane.f32.xlu0 %v348_v57 }
 0x2b3   :  { %v341_v60 = vsub.f32 %v325_v43, %v337_v59 }
 0x2b5   :  { %v951_v61 = vmul.f32 %v527_v28, %v341_v60 }
 0x2b7   :  { %v349_v62 = vmul.f32 %v951_v61, %v951_v61 }
 0x2b8   :  { %v334_v63 = vpop.xlane.xlu2 %333 }
 0x2b9   :  { %v338_v0 = vmul.f32 0.025, %v334_v63  ;;  %355 = vadd.xlane.f32.xlu1 %v349_v62 }
 0x2bb   :  { %v342_v1 = vsub.f32 %v326_v45, %v338_v0 }
 0x2bd   :  { %v955_v2 = vmul.f32 %v527_v28, %v342_v1 }
 0x2bf   :  { %v350_v3 = vmul.f32 %v955_v2, %v955_v2 }
 0x2c1   :  { %357 = vadd.xlane.f32.xlu0 %v350_v3 }
 0x31c   :  { %v352_v19 = vpop.xlane.xlu2 %351 }
 0x31d   :  { %v359_v20 = vmul.f32 0.025, %v352_v19 }
 0x31f   :  { %v363_v21 = vadd.f32 1e-05, %v359_v20 }
 0x321   :  { %599 = vrsqrt.f32 %v363_v21  ;;  %vm373_vm4 = vweird.f32 %v363_v21 }
 0x324   :  { %v354_v22 = vpop.xlane.xlu0 %353 }
 0x325   :  { %v360_v23 = vmul.f32 0.025, %v354_v22 }
 0x327   :  { %v600_v24 = vpop.eup %599  ;;  %v364_v25 = vadd.f32 1e-05, %v360_v23 }
 0x328   :  { %v368_v26 = vmul.f32 %v600_v24, %v363_v21  ;;  %vm374_vm3 = vweird.f32 %v600_v24 }
 0x329   :  { %601 = vrsqrt.f32 %v364_v25  ;;  %vm375_vm5 = vmor %vm373_vm4, %vm374_vm3  ;;  %vm383_vm7 = vweird.f32 %v364_v25 }
 0x32a   :  { %v369_v27 = vmul.f32 %v600_v24, %v368_v26 }
 0x32c   :  { %v370_v28 = vmul.f32 0.5, %v369_v27  ;;  %v356_v29 = vpop.xlane.xlu1 %355 }
 0x32d   :  { %v361_v30 = vmul.f32 0.025, %v356_v29 }
 0x32e   :  { %v371_v31 = vsub.f32 1.5, %v370_v28 }
 0x32f   :  { %v602_v32 = vpop.eup %601  ;;  %v365_v33 = vadd.f32 1e-05, %v361_v30 }
 0x330   :  { %v372_v34 = vmul.f32 %v600_v24, %v371_v31  ;;  %v378_v35 = vmul.f32 %v602_v32, %v364_v25  ;;  %vm384_vm6 = vweird.f32 %v602_v32 }
 0x331   :  { %603 = vrsqrt.f32 %v365_v33  ;;  %vm385_vm8 = vmor %vm383_vm7, %vm384_vm6  ;;  %vm393_vm10 = vweird.f32 %v365_v33 }
 0x332   :  { %v376_v37 = vsel %vm375_vm5, %v600_v24, %v372_v34  ;;  %v379_v38 = vmul.f32 %v602_v32, %v378_v35 }
 0x333   :  { %v407_v39 = vmul.f32 %v376_v37, %v943_v51 }
 0x334   :  { %v380_v9 = vmul.f32 0.5, %v379_v38  ;;  %v358_v41 = vpop.xlane.xlu0 %357 }
 0x335   :  { %v362_v42 = vmul.f32 0.025, %v358_v41  ;;  %v415_v43 = vmul.f32 %v572_v36, %v407_v39 }
 0x336   :  { %v381_v44 = vsub.f32 1.5, %v380_v9 }
 0x337   :  { %v604_v45 = vpop.eup %603  ;;  %v366_v46 = vadd.f32 1e-05, %v362_v42  ;;  %v423_v47 = vadd.f32 %v573_v40, %v415_v43 }
 0x338   :  { %v382_v48 = vmul.f32 %v602_v32, %v381_v44  ;;  %v388_v49 = vmul.f32 %v604_v45, %v365_v33  ;;  %vm394_vm9 = vweird.f32 %v604_v45 }
 0x339   :  { %605 = vrsqrt.f32 %v366_v46  ;;  %463 = vmatmul.f32.vlgmr.msrb.gmra.mxu2 %v423_v47  ;;  %vm395_vm11 = vmor %vm393_vm10, %vm394_vm9  ;;  %vm403_vm13 = vweird.f32 %v366_v46 }
 0x33a   :  { %v389_v50 = vmul.f32 %v604_v45, %v388_v49  ;;  %v386_v51 = vsel %vm385_vm8, %v602_v32, %v382_v48 }
 0x33b   :  { %v408_v52 = vmul.f32 %v386_v51, %v947_v56 }
 0x33c   :  { %v390_v53 = vmul.f32 0.5, %v389_v50 }
 0x33d   :  { %v416_v54 = vmul.f32 %v572_v36, %v408_v52 }
 0x33e   :  { %v391_v55 = vsub.f32 1.5, %v390_v53 }
 0x33f   :  { %v606_v57 = vpop.eup %605  ;;  %v424_v58 = vadd.f32 %v573_v40, %v416_v54 }
 0x340   :  { %v392_v59 = vmul.f32 %v604_v45, %v391_v55  ;;  %v398_v60 = vmul.f32 %v606_v57, %v366_v46  ;;  %vm404_vm12 = vweird.f32 %v606_v57 }
 0x341   :  { %466 = vmatmul.f32.vlgmr.msra.gmra.mxu3 %v424_v58  ;;  %vm405_vm14 = vmor %vm403_vm13, %vm404_vm12 }
 0x342   :  { %v399_v62 = vmul.f32 %v606_v57, %v398_v60  ;;  %v396_v63 = vsel %vm395_vm11, %v604_v45, %v392_v59 }
 0x343   :  { %v409_v0 = vmul.f32 %v396_v63, %v951_v61  ;;  %v574_v61 = vld [vmem:[%s993_s9] ss:$0 sm:$0xff] }
 0x344   :  { %v400_v1 = vmul.f32 0.5, %v399_v62 }
 0x345   :  { %v417_v3 = vmul.f32 %v572_v36, %v409_v0 }
 0x346   :  { %v401_v4 = vsub.f32 1.5, %v400_v1 }
 0x347   :  { %v425_v56 = vadd.f32 %v573_v40, %v417_v3 }
 0x348   :  { %v402_v5 = vmul.f32 %v606_v57, %v401_v4 }
 0x349   :  { %469 = vmatmul.f32.gmra.mxu3 %v425_v56 }
 0x34a   :  { %v406_v6 = vsel %vm405_vm14, %v606_v57, %v402_v5 }
 0x34b   :  { %v410_v8 = vmul.f32 %v406_v6, %v955_v2 }
 0x34d   :  { %v418_v10 = vmul.f32 %v572_v36, %v410_v8 }
 0x34f   :  { %v426_v11 = vadd.f32 %v573_v40, %v418_v10 }
 0x351   :  { %472 = vmatmul.f32.gmra.mxu3 %v426_v11 }
 0x3bc   :  { %v464_v2 = vpop.f32.mrf.mxu2 }
 0x3bd   :  { %v465_v7 = vadd.f32 %v574_v61, %v464_v2 }
 0x3bf   :  { %476 = vst [vmem:[#allocation12] sm:$0xff] %v465_v7 }
 0x3c4   :  { %v467_v12 = vpop.f32.mrf.mxu3 }
 0x3c5   :  { %v468_v13 = vadd.f32 %v574_v61, %v467_v12 }
 0x3c7   :  { %477 = vst [vmem:[#allocation12 + $0x8] sm:$0xff] %v468_v13 }
 0x3cc   :  { %v470_v14 = vpop.f32.mrf.mxu3 }
 0x3cd   :  { %v471_v15 = vadd.f32 %v574_v61, %v470_v14 }
 0x3cf   :  { %478 = vst [vmem:[#allocation12 + $0x10] sm:$0xff] %v471_v15 }
 0x3d4   :  { %v473_v16 = vpop.f32.mrf.mxu3 }
 0x3d5   :  { %v474_v17 = vadd.f32 %v574_v61, %v473_v16 }
 0x3d7   :  { %479 = vst [vmem:[#allocation12 + $0x18] sm:$0xff] %v474_v17 }
 0x3d8   :  { %505 = dma.vmem_to_hbm [thread:$0]  %s498_s12, 512, %s500_s15, [#allocation13], %s786_s25, %s786_s25, %s787_s26  }
 0x3d9   :  { %781 = dma.done.wait [#allocation4], 512  }
 0x3da   :  { %782 = vsyncadd [#allocation4], 4294966784 }
 0x3db   :  { %783 = dma.done.wait [#allocation13], 512  }
 0x3dc   :  { %784 = vsyncadd [#allocation13], 4294966784 }
 0x3dd   :  { %514 = vsyncpa [#allocation3], 1 }
 0x3de   :  { %515 = vsyncpa [#allocation6], 1 }
 0x3df   :  { %516 = vsyncpa [#allocation9], 1 }
 0x3e0   :  { %517 = vsyncpa [#allocation4], 1 }
 0x3e1   :  { %518 = vsyncpa [#allocation13], 1 }

</bundles_post_ra>
